<compile_context>
chip_gen: v7x
topology: tpu7x:2x2x1
jax: 0.10.0
libtpu: 0.0.40
codegen_flags: <defaults>
</compile_context>

<pallas_src>
import jax
import jax.numpy as jnp
from jax.experimental import pallas as pl
from jax.experimental.pallas import tpu as pltpu


# ----------------------------------------------------------------------------
# Kernels
# ----------------------------------------------------------------------------
def _hept_batched_kernel(q_ref, k_ref, o_ref):
    """Small-S path: one grid step handles G heads at full (S, S).

    q_ref, k_ref: (G, S, D) VMEM tiles; o_ref: (G, S, S).
    """
    q = q_ref[...]                      # native dtype, no blanket f32 upcast
    k = k_ref[...]

    # Batched q.k^T on the MXU, contracting the last dim of both operands.
    qk = jnp.einsum("gsd,gtd->gst", q, k, preferred_element_type=jnp.float32)

    q32 = q.astype(jnp.float32)
    k32 = k.astype(jnp.float32)
    qn = -0.5 * jnp.sum(q32 * q32, axis=-1, keepdims=True)   # (G, S, 1)
    kn = -0.5 * jnp.sum(k32 * k32, axis=-1)                  # (G, S)

    # -0.5*||q-k||^2 = q.k - 0.5||q||^2 - 0.5||k||^2, clamped to <= 0
    # (same effect as the non-negative dist_sq in the reference formula).
    logits = jnp.minimum(qk + qn + kn[:, None, :], 0.0)
    # TODO(synk): a lane-dense flattened (1, G*S*S) store would raise lane
    # utilization for tiny S, but needs an in-kernel relayouting reshape;
    # kept as the proven (G, S, S) store for lowering robustness.
    o_ref[...] = jnp.exp(logits).astype(o_ref.dtype)


def _hept_tiled_kernel(q_ref, k_ref, o_ref, qn_ref):
    """Large-S path: one (TQ, TK) output tile per grid step.

    q_ref: (1, TQ, D), k_ref: (1, TK, D), o_ref: (1, TQ, TK)
    qn_ref: (TQ, 1) f32 scratch caching -0.5*||q||^2 for the resident Q tile.
    """
    ki = pl.program_id(2)

    q = q_ref[0]
    k = k_ref[0]

    # ki is the innermost (sequential) axis, so the Q tile is resident across
    # it; compute its squared norms only once per Q tile.
    @pl.when(ki == 0)
    def _():
        q32 = q.astype(jnp.float32)
        qn_ref[...] = -0.5 * jnp.sum(q32 * q32, axis=-1, keepdims=True)

    # q.k^T on the MXU, contracting last dims of both operands (no k.T copy).
    qk = jax.lax.dot_general(
        q, k,
        dimension_numbers=(((1,), (1,)), ((), ())),
        preferred_element_type=jnp.float32,
    )                                                        # (TQ, TK)

    k32 = k.astype(jnp.float32)
    kn = -0.5 * jnp.sum(k32 * k32, axis=-1)                  # (TK,)

    # TODO(synk): on v7x with bf16 output the norm adds could be folded into
    # the MXU contraction (2 augmented columns) and exp done in bf16; kept in
    # f32 for cross-generation safety (v5e has no bf16 VPU/EUP) and to bound
    # Gram-trick cancellation error.
    logits = jnp.minimum(qk + qn_ref[...] + kn[None, :], 0.0)
    o_ref[0] = jnp.exp(logits).astype(o_ref.dtype)


# ----------------------------------------------------------------------------
# Chip-aware sizing helpers
# ----------------------------------------------------------------------------
_MAX_FULL_S = 512     # use the full-(S,S) batched path up to this S


def _vmem_capacity_bytes():
    """VMEM capacity of the current chip; conservative fallback if unknown."""
    try:
        cap = int(pltpu.get_tpu_info().vmem_capacity_bytes)
        if cap > 0:
            return cap
    except Exception:
        pass
    return 64 * 1024 * 1024   # conservative fallback (v7x per-core VMEM)


def _round_up(x, m):
    return ((x + m - 1) // m) * m


def _pick_group(bh, s, d, in_bytes, out_bytes, budget_bytes, min_grid=2):
    """Largest head-group G dividing BH whose footprint fits the budget.

    G is capped so the grid has >= min_grid steps (keeps both v7x
    TensorCores busy; negligible cost on single-core v5e/v6e).
    """
    g_cap = bh if bh < min_grid else bh // min_grid
    g_cap = max(1, min(g_cap, 64))
    best = 1
    for g in range(1, g_cap + 1):
        if bh % g:
            continue
        per_step = (
            2 * 2 * g * s * d * in_bytes      # q,k tiles, double-buffered
            + 2 * g * s * s * out_bytes       # output tile, double-buffered
            + 2 * g * s * s * 4               # f32 qk/logits/exp intermediates
            + 2 * g * s * d * 4               # f32 casts for the norms
        )
        if per_step <= budget_bytes:
            best = g
    return best


def _pick_tiles(s_pad, d, in_bytes, out_bytes, budget_bytes):
    """Pick (TQ, TK): multiples of 128 dividing s_pad, sized to the budget.

    Larger TK cuts grid steps / kn recomputes / K re-DMAs and keeps stores
    lane-dense; the budget (derived from chip VMEM) caps it on v7x.
    """
    def divisors(cap):
        return [t for t in range(cap, 0, -128) if s_pad % t == 0]

    tq = divisors(min(512, s_pad))[0]
    tk = 128
    for t in divisors(min(2048, s_pad)):
        per_step = (
            2 * (tq + t) * d * in_bytes       # q,k tiles, double-buffered
            + 2 * tq * t * out_bytes          # output tile, double-buffered
            + 2 * tq * t * 4                  # f32 qk/logits intermediates
        )
        if per_step <= budget_bytes:
            tk = t
            break
    return tq, tk


# ----------------------------------------------------------------------------
# Wrapper
# ----------------------------------------------------------------------------
def simplified_hept(query, key, *, out_dtype=None):
    """Pallas equivalent of SimplifiedHEPTModel.forward.

    query, key: (B, H, S, D)  ->  (B, H, S, S)

    out_dtype defaults to the input dtype (module semantics).  The kernel is
    HBM-writeback bound, so passing out_dtype=jnp.bfloat16 halves output
    bytes (~2x wall time on all generations) and is strongly recommended
    whenever the consumer tolerates bf16.
    """
    B, H, S, D = query.shape
    assert key.shape == (B, H, S, D)
    if out_dtype is None:
        out_dtype = query.dtype
    BH = B * H

    q_flat = query.reshape(BH, S, D)
    k_flat = key.reshape(BH, S, D)

    in_bytes = jnp.dtype(query.dtype).itemsize
    out_bytes = jnp.dtype(out_dtype).itemsize

    # Chip-derived VMEM budgets (v7x: 64 MiB/TC, v5e/v6e: 128 MiB).
    vmem_cap = _vmem_capacity_bytes()
    vmem_limit = min(vmem_cap // 2, 64 * 1024 * 1024)
    tile_budget = min(vmem_cap // 4, 32 * 1024 * 1024)

    if S <= _MAX_FULL_S:
        # ---- small-S path: G heads per grid step at full (S, S) ----
        G = _pick_group(BH, S, D, in_bytes, out_bytes, tile_budget, min_grid=2)
        out_flat = pl.pallas_call(
            _hept_batched_kernel,
            out_shape=jax.ShapeDtypeStruct((BH, S, S), out_dtype),
            grid_spec=pltpu.PrefetchScalarGridSpec(
                num_scalar_prefetch=0,
                grid=(BH // G,),
                in_specs=[
                    pl.BlockSpec((G, S, D), lambda i: (i, 0, 0)),
                    pl.BlockSpec((G, S, D), lambda i: (i, 0, 0)),
                ],
                out_specs=pl.BlockSpec((G, S, S), lambda i: (i, 0, 0)),
            ),
            compiler_params=pltpu.CompilerParams(
                dimension_semantics=("parallel",),
                vmem_limit_bytes=vmem_limit,
            ),
        )(q_flat, k_flat)
        return out_flat.reshape(B, H, S, S)

    # ---- large-S path: pad S to a multiple of 128 if needed, tile (TQ,TK) --
    S_pad = _round_up(S, 128)
    if S_pad != S:
        pad = S_pad - S
        q_flat = jnp.pad(q_flat, ((0, 0), (0, pad), (0, 0)))
        k_flat = jnp.pad(k_flat, ((0, 0), (0, pad), (0, 0)))

    TQ, TK = _pick_tiles(S_pad, D, in_bytes, out_bytes, tile_budget)

    out_flat = pl.pallas_call(
        _hept_tiled_kernel,
        out_shape=jax.ShapeDtypeStruct((BH, S_pad, S_pad), out_dtype),
        grid_spec=pltpu.PrefetchScalarGridSpec(
            num_scalar_prefetch=0,
            grid=(BH, S_pad // TQ, S_pad // TK),   # ki innermost: Q resident
            in_specs=[
                pl.BlockSpec((1, TQ, D), lambda bh, qi, ki: (bh, qi, 0)),
                pl.BlockSpec((1, TK, D), lambda bh, qi, ki: (bh, ki, 0)),
            ],
            out_specs=pl.BlockSpec(
                (1, TQ, TK), lambda bh, qi, ki: (bh, qi, ki)
            ),
            scratch_shapes=[pltpu.VMEM((TQ, 1), jnp.float32)],
        ),
        compiler_params=pltpu.CompilerParams(
            # ki must stay sequential (q-norm scratch filled at ki == 0);
            # BH and qi give megacore plenty of parallel granularity.
            dimension_semantics=("parallel", "parallel", "arbitrary"),
            vmem_limit_bytes=vmem_limit,
        ),
    )(q_flat, k_flat)

    if S_pad != S:
        out_flat = out_flat[:, :S, :S]
    return out_flat.reshape(B, H, S, S)


def _reference(query, key):
    # Pure-JAX replica of the PyTorch broadcast form for verification.
    diff = query[..., :, None, :] - key[..., None, :, :]
    dist_sq = jnp.sum(diff * diff, axis=-1)
    return jnp.exp(-0.5 * dist_sq)


if __name__ == "__main__":
    # Small shapes consistent with the module's __init__ signature.
    n_heads, batch_size, seq_len, dim_per_head = 4, 2, 8, 32

    rng = jax.random.PRNGKey(0)
    kq, kk, kq2, kk2 = jax.random.split(rng, 4)
    query = jax.random.normal(
        kq, (batch_size, n_heads, seq_len, dim_per_head), dtype=jnp.float32
    )
    key = jax.random.normal(
        kk, (batch_size, n_heads, seq_len, dim_per_head), dtype=jnp.float32
    )

    # 1) Small-S batched path, default (module-semantics) f32 output.
    out = jax.block_until_ready(simplified_hept(query, key))
    ref = _reference(query, key)
    assert out.shape == (batch_size, n_heads, seq_len, seq_len)
    assert jnp.allclose(out, ref, atol=1e-5, rtol=1e-5), "mismatch (batched path)"

    # 2) Same path with the recommended bf16 output (halves HBM writeback).
    out_bf16 = jax.block_until_ready(
        simplified_hept(query, key, out_dtype=jnp.bfloat16)
    )
    assert jnp.allclose(
        out_bf16.astype(jnp.float32), ref, atol=2e-2, rtol=2e-2
    ), "mismatch (bf16 output)"

    # 3) Tiled large-S path with an unaligned S (exercises the pad-to-128
    #    fallback that replaces the old full-(S,S) VMEM-risky path).
    S2, D2 = 600, 32
    q2 = jax.random.normal(kq2, (1, 2, S2, D2), dtype=jnp.float32)
    k2 = jax.random.normal(kk2, (1, 2, S2, D2), dtype=jnp.float32)
    out2 = jax.block_until_ready(simplified_hept(q2, k2))
    ref2 = _reference(q2, k2)
    assert out2.shape == (1, 2, S2, S2)
    assert jnp.allclose(out2, ref2, atol=1e-4, rtol=1e-4), "mismatch (tiled path)"

    print("KERNEL_OK")
</pallas_src>

<mosaic_0001>
module attributes {stable_mosaic.version = 11 : i64} {
  func.func @_hept_batched_kernel(%arg0: i32, %arg1: memref<4x8x32xf32, #tpu.memory_space<vmem>>, %arg2: memref<4x8x32xf32, #tpu.memory_space<vmem>>, %arg3: memref<4x8x8xf32, #tpu.memory_space<vmem>>) attributes {dimension_semantics = [#tpu.dimension_semantics<parallel>], iteration_bounds = array<i64: 2>, scalar_prefetch = 0 : i64, scratch_operands = 0 : i64, tpu.core_type = #tpu.core_type<tc>, window_params = [{transform_indices = @transform_0, window_bounds = array<i64: 4, 8, 32>}, {transform_indices = @transform_1, window_bounds = array<i64: 4, 8, 32>}, {transform_indices = @transform_2, window_bounds = array<i64: 4, 8, 8>}]} {
    %c0 = arith.constant 0 : index
    %c0_0 = arith.constant 0 : index
    %c0_1 = arith.constant 0 : index
    %0 = vector.load %arg1[%c0, %c0_0, %c0_1] : memref<4x8x32xf32, #tpu.memory_space<vmem>>, vector<4x8x32xf32>
    %c0_2 = arith.constant 0 : index
    %c0_3 = arith.constant 0 : index
    %c0_4 = arith.constant 0 : index
    %1 = vector.load %arg2[%c0_2, %c0_3, %c0_4] : memref<4x8x32xf32, #tpu.memory_space<vmem>>, vector<4x8x32xf32>
    "tpu.trace_start"() <{level = 10 : i32, message = "gsd,gtd->gst"}> : () -> ()
    %cst = arith.constant dense<0.000000e+00> : vector<4x8x8xf32>
    %2 = tpu.matmul %0, %1, %cst {dimension_numbers = #tpu.dot_dimension_numbers<[2], [2], [1], [1], [0, 0, 0, 1, 1, 1], [0], [0]>} : vector<4x8x32xf32>, vector<4x8x32xf32>, vector<4x8x8xf32> -> vector<4x8x8xf32>
    "tpu.trace_stop"() : () -> ()
    %3 = arith.mulf %0, %0 : vector<4x8x32xf32>
    %cst_5 = arith.constant dense<0.000000e+00> : vector<4x8xf32>
    %4 = vector.multi_reduction <add>, %3, %cst_5 [2] : vector<4x8x32xf32> to vector<4x8xf32>
    %5 = vector.shape_cast %4 : vector<4x8xf32> to vector<4x8x1xf32>
    %cst_6 = arith.constant -5.000000e-01 : f32
    %6 = vector.broadcast %cst_6 : f32 to vector<4x8x1xf32>
    %7 = arith.mulf %6, %5 : vector<4x8x1xf32>
    %8 = arith.mulf %1, %1 : vector<4x8x32xf32>
    %cst_7 = arith.constant dense<0.000000e+00> : vector<4x8xf32>
    %9 = vector.multi_reduction <add>, %8, %cst_7 [2] : vector<4x8x32xf32> to vector<4x8xf32>
    %cst_8 = arith.constant -5.000000e-01 : f32
    %10 = vector.broadcast %cst_8 : f32 to vector<4x8xf32>
    %11 = arith.mulf %10, %9 : vector<4x8xf32>
    %12 = vector.broadcast %7 : vector<4x8x1xf32> to vector<4x8x8xf32>
    %13 = arith.addf %2, %12 : vector<4x8x8xf32>
    %14 = vector.shape_cast %11 : vector<4x8xf32> to vector<4x1x8xf32>
    %15 = vector.broadcast %14 : vector<4x1x8xf32> to vector<4x8x8xf32>
    %16 = arith.addf %13, %15 : vector<4x8x8xf32>
    %cst_9 = arith.constant 0.000000e+00 : f32
    %17 = vector.broadcast %cst_9 : f32 to vector<4x8x8xf32>
    %18 = arith.minimumf %16, %17 : vector<4x8x8xf32>
    %19 = math.exp %18 : vector<4x8x8xf32>
    %c0_10 = arith.constant 0 : index
    %c0_11 = arith.constant 0 : index
    %c0_12 = arith.constant 0 : index
    %20 = vector.load %arg3[%c0_10, %c0_11, %c0_12] : memref<4x8x8xf32, #tpu.memory_space<vmem>>, vector<4x8x8xf32>
    tpu.vector_store %arg3[%c0_10, %c0_11, %c0_12], %19 {strides = array<i32>} : memref<4x8x8xf32, #tpu.memory_space<vmem>>, vector<4x8x8xf32>,
    return
  }
  func.func @transform_0(%arg0: i32) -> (i32, i32, i32) {
    %c0_i32 = arith.constant 0 : i32
    %c0_i32_0 = arith.constant 0 : i32
    %c0_i32_1 = arith.constant 0 : i32
    return %arg0, %c0_i32, %c0_i32_0 : i32, i32, i32
  }
  func.func @transform_1(%arg0: i32) -> (i32, i32, i32) {
    %c0_i32 = arith.constant 0 : i32
    %c0_i32_0 = arith.constant 0 : i32
    %c0_i32_1 = arith.constant 0 : i32
    return %arg0, %c0_i32, %c0_i32_0 : i32, i32, i32
  }
  func.func @transform_2(%arg0: i32) -> (i32, i32, i32) {
    %c0_i32 = arith.constant 0 : i32
    %c0_i32_0 = arith.constant 0 : i32
    %c0_i32_1 = arith.constant 0 : i32
    return %arg0, %c0_i32, %c0_i32_0 : i32, i32, i32
  }
}

</mosaic_0001>

<bundles_post_ra>
// kernel: tpu_custom_call.1
= control target key start
LH: loop header
LB: loop body
LE: loop exit
PB: predicated region body
PF: predicated region fallthrough
CT: control target
= control target key end

     0   :  { %7 = vsyncpa [#allocation3], 0  ;;  %s1271_s0 = inlined_call_operand.hbm [shape: f32[8,8,32], index: 0, kind: input, shape index: {}]   ;;  %s1272_s1 = inlined_call_operand.hbm [shape: f32[8,8,32], index: 1, kind: input, shape index: {}]   ;;  %s1273_s2 = inlined_call_operand.hbm [shape: f32[8,8,8], index: 2, kind: output, shape index: {}]  }
   0x1   :  { %9 = vsyncpa [#allocation3 + $0x1], 0 }
   0x2   :  { %10 = vsyncpa [#allocation6], 0 }
   0x3   :  { %12 = vsyncpa [#allocation6 + $0x1], 0 }
   0x4   :  { %13 = vsyncpa [#allocation4], 0 }
   0x5   :  { %15 = vsyncpa [#allocation4 + $0x1], 0  ;;  %s1023_s9 = smov 0   ;;  %s1025_s10 = smov 0  }
   0x6   :  { %s1027_s11 = smov 0   ;;  %s1029_s12 = smov 0  }
   0x7 LB: > { %s1044_s13 = sadd.s32 4294967295, %s997_s12   ;;  %s745_s14 = sadd.s32 4294967294, %s997_s12   ;;  %s997_s12 = sphi %s1029_s12, %s1289_s12   ;;  %s993_s11 = sphi %s1027_s11, %s1288_s11   ;;  %s989_s10 = sphi %s1025_s10, %s1287_s10   ;;  %s985_s9 = sphi %s1023_s9, %s1286_s9  }
   0x8   : > { %s1048_s15 = sadd.s32 1, %s997_s12   ;;  %s28_s16 = sadd.s32 1, %s993_s11 }
   0x9   : > { %s25_s17 = ssub.s32 %s997_s12, %s1048_s15  ;;  %p35_p0 = scmp.ne.s32.totalorder %s993_s11, %s989_s10 }
   0xa   : > { %p26_p1 = scmp.eq.s32.totalorder %s25_s17, 0  ;;  %p36_p2 = scmp.eq.s32.totalorder %s997_s12, 0 }
   0xb   : > { %p41_p3 = scmp.ne.s32.totalorder %s989_s10, %s985_s9  ;;  %p42_p4 = scmp.eq.s32.totalorder %s1044_s13, 0 }
   0xc   : > { %s1060_s18 = scalar_select %p26_p1, %s993_s11, %s28_s16  }
   0xd   : > { %p1062_p5 = por %p36_p2, %p35_p0  ;;  %p1066_p6 = por %p42_p4, %p41_p3 }
   0xe   : > { %p91_p7 = scmp.eq.s32.totalorder %s1044_s13, 1  ;;  %p97_p8 = scmp.eq.s32.totalorder %s745_s14, 1 }
   0xf   : > { %s1277_s20 = scalar_select %p1066_p6, 1, 0 }
  0x10   : > { %p819_p10 = scmp.lt.s32.totalorder %s997_s12, 2  ;;  %p1073_p11 = por %p91_p7, %p35_p0 }
  0x11   : > { %p1077_p12 = por %p97_p8, %p41_p3  ;;  %s1082_s23 = sand.u32 1, %s993_s11  }
  0x12   : > { %s1278_s21 = scalar_select %p1073_p11, 1, 0 }
  0x13   : > { %s1279_s22 = scalar_select %p1077_p12, 1, 0 }
  0x14   : > { %s771_s24 = sshll.u32 %s997_s12, 9  ;;  %s748_s25 = sshll.u32 %s1082_s23, 5 }
  0x15   : > { %s1091_s28 = scalar_lea.hbm %s1271_s0, %s771_s24  ;;  %s121_s29 = scalar_lea.vmem [#allocation2], %s748_s25 }
  0x16   : > { %s128_s30 = sshll.u32 %s121_s29, 4  ;;  %p1097_p13 = pnand %p819_p10, %p1062_p5  ;;  %s1101_s30 = int_to_ptr.vmem [resolvable:$true] %s128_s30 }
  0x17   : > { %s118_s4 = scalar_lea.sflag [#allocation3], %s1082_s23  ;;  %s867_s5 = scalar_lea.hbm %s1091_s28, 512 }
  0x18   : > { %p868_p0 = scmp.ne.s32.totalorder %s1091_s28, %s867_s5  ;;  %p869_p1 = pneg %p1097_p13 }
  0x19   : > { %s872_s8 = scalar_lea.hbm %s1271_s0, 1024  ;;  %p873_p4 = scmp.lt.u32.totalorder %s1091_s28, %s1271_s0 }
  0x1a   : > { %p870_p2 = pnand %p869_p1, %p868_p0  ;;  %p874_p5 = scmp.lt.u32.totalorder %s872_s8, %s867_s5 }
  0x1b   : > { %p876_p8 = scmp.lt.u32.totalorder %s867_s5, %s1091_s28 }
  0x1c   : > { %p871_p3 = pneg %p870_p2  ;;  %p875_p7 = por %p874_p5, %p873_p4 }
  0x1e   : > { %p877_p10 = por %p876_p8, %p875_p7 }
  0x20   : > { %p878_p9 = pnand %p877_p10, %p871_p3 }
  0x22   : > { %881 = shalt.err (!%p878_p9)
}
  0x23   : > { %s882_s17 = scalar_lea.vmem %s1101_s30, 512  ;;  %s999_s19 = smov [#allocation2]  }
  0x24   : > { %p883_p0 = scmp.ne.s32.totalorder %s1101_s30, %s882_s17  ;;  %s887_s26 = sshll.u32 %s999_s19, 4  ;;  %s888_s26 = int_to_ptr.vmem [resolvable:$false] %s887_s26 }
  0x25   : > { %s889_s27 = scalar_lea.vmem %s888_s26, 1024  ;;  %p890_p11 = scmp.lt.s32.totalorder %s1101_s30, %s888_s26 }
  0x26   : > { %p885_p2 = pnand %p883_p0, %p869_p1  ;;  %p891_p4 = scmp.lt.s32.totalorder %s889_s27, %s882_s17 }
  0x28   : > { %p886_p12 = pneg %p885_p2  ;;  %p892_p5 = por %p891_p4, %p890_p11 }
  0x2a   : > { %p893_p7 = pnand %p892_p5, %p886_p12 }
  0x2c   : > { %896 = shalt.err (!%p893_p7)
}
  0x2d   : > { %s1000_s29 = smov 128   ;;  %s1001_s5 = smov 8  }
  0x2e   : > { %811 = dma.hbm_to_vmem [thread:$0]  (!%p1097_p13), %s1091_s28, 512, %s1101_s30, %s118_s4, %s1000_s29, %s1000_s29, %s1001_s5  }
  0x2f   : > { %p754_p9 = scmp.ge.s32.totalorder %s997_s12, 1  ;;  %p157_p11 = scmp.lt.s32.totalorder %s997_s12, 3 }
  0x30   : > { %s1145_s14 = scalar_lea.hbm %s1272_s1, %s771_s24  ;;  %s142_s16 = scalar_lea.vmem [#allocation5], %s748_s25 }
  0x31   : > { %p1136_p12 = pnand %p754_p9, %p157_p11  ;;  %s149_s17 = sshll.u32 %s142_s16, 4  ;;  %s1149_s17 = int_to_ptr.vmem [resolvable:$true] %s149_s17 }
  0x32   : > { %s139_s28 = scalar_lea.sflag [#allocation6], %s1082_s23  ;;  %s897_s30 = scalar_lea.hbm %s1145_s14, 512 }
  0x33   : > { %p898_p3 = scmp.ne.s32.totalorder %s1145_s14, %s897_s30  ;;  %s902_s24 = scalar_lea.hbm %s1272_s1, 1024 }
  0x34   : > { %p903_p0 = scmp.lt.u32.totalorder %s1145_s14, %s1272_s1  ;;  %p904_p2 = scmp.lt.u32.totalorder %s902_s24, %s897_s30 }
  0x35   : > { %p900_p8 = pnand %p898_p3, %p869_p1  ;;  %p906_p5 = scmp.lt.u32.totalorder %s897_s30, %s1145_s14 }
  0x36   : > { %p905_p4 = por %p904_p2, %p903_p0 }
  0x37   : > { %p901_p10 = pneg %p900_p8 }
  0x38   : > { %p907_p7 = por %p906_p5, %p905_p4 }
  0x3a   : > { %p908_p9 = pnand %p907_p7, %p901_p10 }
  0x3c   : > { %911 = shalt.err (!%p908_p9)
}
  0x3d   : > { %s912_s25 = scalar_lea.vmem %s1149_s17, 512  ;;  %s1002_s7 = smov [#allocation5]  }
  0x3e   : > { %p913_p11 = scmp.ne.s32.totalorder %s1149_s17, %s912_s25  ;;  %s917_s8 = sshll.u32 %s1002_s7, 4  ;;  %s918_s8 = int_to_ptr.vmem [resolvable:$false] %s917_s8 }
  0x3f   : > { %s919_s16 = scalar_lea.vmem %s918_s8, 1024  ;;  %p920_p6 = scmp.lt.s32.totalorder %s1149_s17, %s918_s8 }
  0x40   : > { %p915_p3 = pnand %p913_p11, %p869_p1  ;;  %p921_p0 = scmp.lt.s32.totalorder %s919_s16, %s912_s25 }
  0x42   : > { %p916_p8 = pneg %p915_p3  ;;  %p922_p2 = por %p921_p0, %p920_p6 }
  0x44   : > { %p923_p4 = pnand %p922_p2, %p916_p8 }
  0x46   : > { %926 = shalt.err (!%p923_p4)
}
  0x47   : > { %814 = dma.hbm_to_vmem [thread:$0]  (!%p1097_p13), %s1145_s14, 512, %s1149_s17, %s139_s28, %s1000_s29, %s1000_s29, %s1001_s5  }
  0x48   : > { %161 = sbr.rel (%p1136_p12) target bundleno = 339 (0x153), region = 28  ;;  %s1183_s30 = sand.u32 (!%p1136_p12), 1, %s989_s10  }
  0x49   : > { %s1186_s4 = sshll.u32 (!%p1136_p12), %s1183_s30, 5  ;;  %s164_s3 = scalar_lea.sflag (!%p1136_p12), [#allocation3], %s1183_s30 }
  0x4a   : > { %s167_s19 = scalar_lea.vmem (!%p1136_p12), [#allocation2], %s1186_s4  ;;  %p1282_p6 = scmp.ne.s32.totalorder (!%p1136_p12), %s1277_s20, 0 }
  0x4f   : > { %972 = dma.done.wait (%p1282_p6), %s164_s3, 512  }
  0x50   : > { %974 = vsyncadd (%p1282_p6), %s164_s3, 4294966784  ;;  %s173_s23 = scalar_lea.sflag [#allocation6], %s1183_s30  ;;  %s176_s29 = scalar_lea.vmem [#allocation5], %s1186_s4 }
  0x51   : > { %976 = dma.done.wait (%p1282_p6), %s173_s23, 512  }
  0x52   : > { %978 = vsyncadd (%p1282_p6), %s173_s23, 4294966784  ;;  %v1003_v0 = vmov 0.0   ;;  %vm1004_vm0 = vmmov 0   ;;  %vm217_vm1 = vcmask 261120   ;;  %v209_v1 = vld [vmem:[%s176_s29] sm:$0xff]  ;;  %v210_v2 = vld [vmem:[%s176_s29 + $0x8] sm:$0xff]  ;;  %v562_v29 = vlaneseq }
  0x53   : > { %782 = vmatprep.subr.mxu0 %v1003_v0  ;;  %787 = vmatprep.subr.mxu1 %v1003_v0  ;;  %v205_v3 = vld [vmem:[%s167_s19] sm:$0xff]  ;;  %v206_v4 = vld [vmem:[%s167_s19 + $0x8] sm:$0xff]  ;;  %v211_v6 = vld [vmem:[%s176_s29 + $0x10] sm:$0xff]  ;;  %v235_v17 = vmul.f32 %v210_v2, %v210_v2  ;;  %v234_v18 = vmul.f32 %v209_v1, %v209_v1  ;;  %vm630_vm2 = vcmask 64512   ;;  %s773_s20 = sshll.u32 %s1044_s13, 9  ;;  %s201_s5 = scalar_lea.vmem [#allocation7], %s1186_s4 }
  0x54   : > { %784 = vmatprep.mubr.msk.f32.mxu0 %vm1004_vm0, %v1003_v0  ;;  %789 = vmatprep.mubr.msk.f32.mxu1 %vm1004_vm0, %v1003_v0  ;;  %v213_v5 = vmul.f32 %v205_v3, %v205_v3  ;;  %v212_v7 = vld [vmem:[%s176_s29 + $0x18] sm:$0xff]  ;;  %v207_v8 = vld [vmem:[%s167_s19 + $0x10] sm:$0xff]  ;;  %v214_v13 = vmul.f32 %v206_v4, %v206_v4  ;;  %v236_v22 = vmul.f32 %v211_v6, %v211_v6  ;;  %v563_v32 = vand.u32 127, %v562_v29  ;;  %s649_s6 = sshll.u32 %s201_s5, 4  ;;  %s1225_s28 = scalar_lea.hbm %s1273_s2, %s773_s20  ;;  %s1227_s6 = int_to_ptr.vmem [resolvable:$true] %s649_s6 }
  0x55   : > { %783 = vmatpush3.xpose.msk.msra.mxu0 %vm217_vm1, %v209_v1  ;;  %788 = vmatpush3.xpose.msk.msra.mxu1 %vm217_vm1, %v210_v2  ;;  %v208_v9 = vld [vmem:[%s167_s19 + $0x18] sm:$0xff]  ;;  %v215_v10 = vmul.f32 %v207_v8, %v207_v8  ;;  %v241_v19 = vsel %vm217_vm1, %v235_v17, 0.0  ;;  %v238_v20 = vsel %vm217_vm1, %v234_v18, 0.0  ;;  %v237_v21 = vmul.f32 %v212_v7, %v212_v7  ;;  %s636_s13 = scalar_lea.sflag [#allocation4], %s1183_s30  ;;  %s927_s24 = scalar_lea.vmem %s1227_s6, 512 }
  0x56   : > { %792 = vmatprep.subr.mxu0 %v1003_v0  ;;  %797 = vmatprep.subr.mxu1 %v1003_v0  ;;  %v218_v11 = vsel %vm217_vm1, %v213_v5, 0.0  ;;  %v216_v12 = vmul.f32 %v208_v9, %v208_v9  ;;  %v221_v16 = vsel %vm217_vm1, %v214_v13, 0.0  ;;  %v244_v24 = vsel %vm217_vm1, %v236_v22, 0.0  ;;  %p928_p13 = scmp.ne.s32.totalorder %s1227_s6, %s927_s24  ;;  %p1283_p1 = scmp.ne.s32.totalorder %s1278_s21, 0 }
  0x57   : > { %v224_v14 = vsel %vm217_vm1, %v215_v10, 0.0  ;;  %219 = vadd.xlane.f32.xlu0 %v218_v11  ;;  %v247_v23 = vsel %vm217_vm1, %v237_v21, 0.0  ;;  %v565_v33 = vshrl.u32 %v562_v29, 7  ;;  %s1005_s26 = smov [#allocation7]  }
  0x58   : > { %785 = vmatmul.mubr.msk.f32.vlgmr.msra.gmra.mrb[0].mxu0 %vm217_vm1, %v205_v3  ;;  %790 = vmatmul.mubr.msk.f32.vlgmr.msra.gmra.mrb[0].mxu1 %vm217_vm1, %v206_v4  ;;  %v227_v15 = vsel %vm217_vm1, %v216_v12, 0.0  ;;  %p929_p12 = pnand %p928_p13, %p1283_p1  ;;  %s931_s27 = sshll.u32 %s1005_s26, 4  ;;  %s932_s27 = int_to_ptr.vmem [resolvable:$false] %s931_s27 }
  0x59   : > { %793 = vmatpush3.xpose.msk.msra.mxu0 %vm217_vm1, %v211_v6  ;;  %798 = vmatpush3.xpose.msk.msra.mxu1 %vm217_vm1, %v212_v7  ;;  %v566_v34 = vsub.s32 %v563_v32, %v565_v33  ;;  %s933_s25 = scalar_lea.vmem %s932_s27, 1024  ;;  %p934_p5 = scmp.lt.s32.totalorder %s1227_s6, %s932_s27 }
  0x5a   : > { %794 = vmatprep.mubr.msk.f32.mxu0 %vm1004_vm0, %v1003_v0  ;;  %799 = vmatprep.mubr.msk.f32.mxu1 %vm1004_vm0, %v1003_v0  ;;  %p930_p10 = pneg %p929_p12  ;;  %p935_p7 = scmp.lt.s32.totalorder %s933_s25, %s927_s24 }
  0x5b   : > { %225 = vadd.xlane.f32.xlu1 %v224_v14  ;;  %222 = vadd.xlane.f32.xlu0 %v221_v16 }
  0x5c   : > { %795 = vmatmul.mubr.msk.f32.vlgmr.msra.gmra.mrb[2].mxu0 %vm217_vm1, %v207_v8  ;;  %800 = vmatmul.mubr.msk.f32.vlgmr.msra.gmra.mrb[2].mxu1 %vm217_vm1, %v208_v9  ;;  %p936_p9 = por %p935_p7, %p934_p5 }
  0x5e   : > { %p937_p11 = pnand %p936_p9, %p930_p10 }
  0x5f   : > { %228 = vadd.xlane.f32.xlu1 %v227_v15  ;;  %239 = vadd.xlane.f32.xlu0 %v238_v20 }
  0x63   : > { %242 = vadd.xlane.f32.xlu1 %v241_v19  ;;  %245 = vadd.xlane.f32.xlu0 %v244_v24 }
  0x67   : > { %248 = vadd.xlane.f32.xlu1 %v247_v23 }
  0xe4   : > { %v220_v26 = vpop.xlane.xlu0 %219 }
  0xe5   : > { %v230_v39 = vmul.f32 -0.5, %v220_v26 }
  0xe8   : > { %v226_v25 = vpop.xlane.xlu1 %225  ;;  %v223_v28 = vpop.xlane.xlu0 %222 }
  0xe9   : > { %v231_v40 = vmul.f32 -0.5, %v223_v28  ;;  %v232_v51 = vmul.f32 -0.5, %v226_v25 }
  0xec   : > { %v229_v27 = vpop.xlane.xlu1 %228  ;;  %v240_v31 = vpop.xlane.xlu0 %239 }
  0xed   : > { %v250_v36 = vmul.f32 -0.5, %v240_v31  ;;  %v233_v52 = vmul.f32 -0.5, %v229_v27 }
  0xef   : > { %v567_v42 = vrot.slane %v250_v36, %v566_v34 }
  0xf0   : > { %v243_v30 = vpop.xlane.xlu1 %242  ;;  %v246_v38 = vpop.xlane.xlu0 %245 }
  0xf1   : > { %v251_v35 = vmul.f32 -0.5, %v243_v30  ;;  %v252_v44 = vmul.f32 -0.5, %v246_v38 }
  0xf3   : > { %v571_v41 = vrot.slane %v251_v35, %v566_v34  ;;  %v575_v56 = vrot.slane %v252_v44, %v566_v34 }
  0xf4   : > { %v249_v37 = vpop.xlane.xlu1 %248 }
  0xf5   : > { %v253_v43 = vmul.f32 -0.5, %v249_v37 }
  0xf7   : > { %v579_v55 = vrot.slane %v253_v43, %v566_v34 }
 0x12b   : > { %v326_v45 = vpop.f32.mrb[0].mxu0  ;;  %v402_v46 = vpop.f32.mrb[0].mxu1 }
 0x12c   : > { %v327_v47 = vadd.f32 %v326_v45, %v230_v39  ;;  %v403_v48 = vadd.f32 %v402_v46, %v231_v40  ;;  %v786_v49 = vpop.f32.mrb[1].mxu0  ;;  %v791_v50 = vpop.f32.mrb[1].mxu1 }
 0x12e   : > { %v614_v53 = vadd.f32 %v567_v42, %v327_v47  ;;  %v615_v54 = vadd.f32 %v571_v41, %v403_v48 }
 0x12f   : > { %v478_v57 = vpop.f32.mrb[2].mxu0  ;;  %v554_v58 = vpop.f32.mrb[2].mxu1 }
 0x130   : > { %v618_v59 = vmin.f32 %v614_v53, 0.0  ;;  %v619_v60 = vmin.f32 %v615_v54, 0.0  ;;  %v479_v61 = vadd.f32 %v478_v57, %v232_v51  ;;  %v555_v62 = vadd.f32 %v554_v58, %v233_v52  ;;  %v796_v63 = vpop.f32.mrb[3].mxu0  ;;  %v801_v0 = vpop.f32.mrb[3].mxu1 }
 0x132   : > { %v622_v1 = vmul.f32 1.442695, %v618_v59  ;;  %v624_v2 = vmul.f32 1.442695, %v619_v60  ;;  %v616_v3 = vadd.f32 %v575_v56, %v479_v61  ;;  %v617_v4 = vadd.f32 %v579_v55, %v555_v62 }
 0x134   : > { %859 = vpow2.f32 %v622_v1  ;;  %v620_v5 = vmin.f32 %v616_v3, 0.0  ;;  %v621_v6 = vmin.f32 %v617_v4, 0.0 }
 0x135   : > { %861 = vpow2.f32 %v624_v2 }
 0x136   : > { %v626_v7 = vmul.f32 1.442695, %v620_v5  ;;  %v628_v8 = vmul.f32 1.442695, %v621_v6 }
 0x138   : > { %863 = vpow2.f32 %v626_v7 }
 0x139   : > { %865 = vpow2.f32 %v628_v8 }
 0x13e   : > { %v860_v9 = vpop.eup %859 }
 0x13f   : > { %v862_v10 = vpop.eup %861  ;;  %631 = vst.msk [vmem:[%s201_s5] sm:$0xff] %vm630_vm2, %v860_v9 }
 0x140   : > { %632 = vst.msk [vmem:[%s201_s5 + $0x8] sm:$0xff] %vm630_vm2, %v862_v10 }
 0x142   : > { %v864_v11 = vpop.eup %863 }
 0x143   : > { %v866_v12 = vpop.eup %865  ;;  %633 = vst.msk [vmem:[%s201_s5 + $0x10] sm:$0xff] %vm630_vm2, %v864_v11 }
 0x144   : > { %634 = vst.msk [vmem:[%s201_s5 + $0x18] sm:$0xff] %vm630_vm2, %v866_v12 }
 0x145   : > { %940 = shalt.err (!%p937_p11)
}
 0x146   : > { %s941_s7 = scalar_lea.hbm %s1225_s28, 512  ;;  %s945_s4 = scalar_lea.hbm %s1273_s2, 1024 }
 0x147   : > { %p942_p3 = scmp.ne.s32.totalorder %s1225_s28, %s941_s7  ;;  %p946_p2 = scmp.lt.u32.totalorder %s1225_s28, %s1273_s2 }
 0x148   : > { %p947_p4 = scmp.lt.u32.totalorder %s945_s4, %s941_s7  ;;  %p949_p13 = scmp.lt.u32.totalorder %s941_s7, %s1225_s28 }
 0x149   : > { %p943_p8 = pnand %p942_p3, %p1283_p1 }
 0x14a   : > { %p948_p6 = por %p947_p4, %p946_p2 }
 0x14b   : > { %p944_p0 = pneg %p943_p8 }
 0x14c   : > { %p950_p12 = por %p949_p13, %p948_p6 }
 0x14e   : > { %p951_p10 = pnand %p950_p12, %p944_p0 }
 0x150   : > { %954 = shalt.err (!%p951_p10)
}
 0x151   : > { %s1006_s23 = smov 128   ;;  %s1007_s29 = smov 8  }
 0x152   : > { %806 = dma.vmem_to_hbm [thread:$0]  (%p1283_p1), %s1227_s6, 512, %s1225_s28, %s636_s13, %s1006_s23, %s1006_s23, %s1007_s29  }
 0x153 PF: > { %s664_s20 = sand.u32 1, %s985_s9   ;;  %p1284_p5 = scmp.ne.s32.totalorder %s1279_s22, 0 }
 0x154   : > { %p1285_p7 = scmp.ge.s32.totalorder %s997_s12, 2  ;;  %s665_s5 = scalar_lea.sflag [#allocation4], %s664_s20 }
 0x156   : > { %p816_p9 = pnand %p1285_p7, %p1284_p5 }
 0x158   : > { %980 = dma.done.wait (!%p816_p9), %s665_s5, 512  }
 0x159   : > { %982 = vsyncadd (!%p816_p9), %s665_s5, 4294966784  ;;  %p18_p11 = scmp.ge.s32.totalorder %s1048_s15, 4   ;;  %s1286_s9 = smov %s989_s10 }
 0x15a   : > { %s1287_s10 = smov %s993_s11  ;;  %s1288_s11 = smov %s1060_s18 }
 0x15b   : > { %s1289_s12 = smov %s1048_s15  ;;  %20 = sbr.rel (!%p18_p11) target bundleno = 7 (0x7), region = 86 }
 0x162   :  { %670 = vsyncpa [#allocation3], 1 }
 0x163   :  { %672 = vsyncpa [#allocation3 + $0x1], 1 }
 0x164   :  { %673 = vsyncpa [#allocation6], 1 }
 0x165   :  { %675 = vsyncpa [#allocation6 + $0x1], 1 }
 0x166   :  { %676 = vsyncpa [#allocation4], 1 }
 0x167   :  { %678 = vsyncpa [#allocation4 + $0x1], 1 }

</bundles_post_ra>
